<compile_context>
chip_gen: v5e
topology: v5e:2x2
jax: 0.10.0
libtpu: 0.0.40
codegen_flags: <defaults>
</compile_context>

<pallas_src>
import math

import jax
import jax.numpy as jnp
from jax.experimental import pallas as pl
from jax.experimental.pallas import tpu as pltpu


def _parallel_linear_kernel(x_ref, w_ref, b_ref, o_ref, acc_ref):
    """One grid step: hb heads of a (B, tk) x (tk, tn) matmul.

    x_ref  : (hb, B, tk)   activations, head-major
    w_ref  : (hb, tk, tn)  weight stored (H, IN, OUT) -> lane-dense MXU RHS, no relayout
    b_ref  : (hb, 1, tn)
    o_ref  : (hb, B, tn)
    acc_ref: (hb, B, tn) float32 accumulator, resident across the IN (k) grid axis.
    """
    k = pl.program_id(2)

    @pl.when(k == 0)
    def _():
        acc_ref[...] = jnp.zeros_like(acc_ref)

    acc_ref[...] += jnp.einsum(
        "hbk,hkn->hbn", x_ref[...], w_ref[...],
        preferred_element_type=jnp.float32)

    @pl.when(k == pl.num_programs(2) - 1)
    def _():
        o_ref[...] = (acc_ref[...] + b_ref[...].astype(jnp.float32)).astype(o_ref.dtype)


# ---------------------------------------------------------------------------
# Sizing helpers
# ---------------------------------------------------------------------------

def _vmem_plan():
    """Per-chip-generation VMEM sizing.

    budget: bytes the double/triple-buffered per-step tiles may use (sizing model).
    limit : scoped-VMEM grant passed to the compiler (<= 3/4 of physical VMEM).
    """
    try:
        cap = int(pltpu.get_tpu_info().vmem_capacity_bytes)
    except Exception:
        cap = 0
    if cap <= 0:
        cap = 64 * 1024 * 1024            # conservative (v7x-sized) fallback
    budget = cap // 4                      # v7x: 16 MiB, v5e/v6e: 32 MiB
    limit = (cap * 3) // 4                 # v7x: 48 MiB, v5e/v6e: 96 MiB
    return budget, limit


def _pick_tile(dim, cap):
    """Full dim if it fits the cap, else the largest MXU-friendly tile dividing dim.

    Prefers 256-multiples (v6e/v7x 256x256 MXU width), falls back to 128-multiples.
    """
    if dim <= cap:
        return dim
    for quantum in (256, 128):
        t = (cap // quantum) * quantum
        while t >= quantum:
            if dim % t == 0:
                return t
            t -= quantum
    return dim  # indivisible: fall back to full dim (hb shrinks to compensate)


def _shrink_tile(dim, cur):
    """Next smaller 128-multiple below `cur` that divides dim, or None."""
    t = ((cur - 1) // 128) * 128
    while t >= 128:
        if dim % t == 0:
            return t
        t -= 128
    return None


def _step_bytes(hb, B, tk, tn, itemsize, w_buffers):
    w = hb * tk * tn * itemsize
    x = hb * B * tk * itemsize
    o = hb * B * tn * itemsize
    b = hb * tn * itemsize
    acc = hb * B * tn * 4
    # weight stream is w_buffers-deep; everything else is double-buffered by Pallas.
    return w_buffers * w + 2 * (x + o + b) + acc


def _pick_heads_per_block(H, B, tk, tn, itemsize, budget, w_buffers):
    """Largest divisor of H whose buffered per-step tiles fit the budget."""
    hb = H
    while hb > 1 and _step_bytes(hb, B, tk, tn, itemsize, w_buffers) > budget:
        hb -= 1
        while hb > 1 and H % hb != 0:
            hb -= 1
    return max(1, hb)


# ---------------------------------------------------------------------------
# Public API
# ---------------------------------------------------------------------------

def prepare_weight(weight_oi):
    """One-off INIT-TIME relayout of the torch-native (H, OUT, IN) weight into the
    kernel's stored layout (H, IN, OUT).  Call once when parameters are created or
    loaded -- never per forward call."""
    return jnp.transpose(weight_oi, (0, 2, 1))


def parallel_linear(x, weight_io, bias, *, tile_cap=512, return_head_major=False,
                    weight_buffer_depth=3):
    """ParallelLinear forward.

    x        : (B, H, IN)
    weight_io: (H, IN, OUT)   -- the stored layout (see prepare_weight)
    bias     : (H, OUT)
    returns  : (B, H, OUT), or (H, B, OUT) if return_head_major=True.
    """
    B, H, IN = x.shape
    H_w, IN_w, OUT = weight_io.shape
    assert H == H_w and IN == IN_w, "weight must be stored as (heads, in_features, out_features)"
    assert bias.shape == (H, OUT)

    itemsize = jnp.dtype(x.dtype).itemsize
    budget, vmem_limit = _vmem_plan()

    tk = _pick_tile(IN, tile_cap)   # reduction tile (full dim keeps x resident per head group)
    tn = _pick_tile(OUT, tile_cap)  # output-lane tile
    hb = _pick_heads_per_block(H, B, tk, tn, itemsize, budget, weight_buffer_depth)

    # Fallback: if even a single-head block exceeds the budget (e.g. very large B),
    # shrink tn then tk instead of compiling into a VMEM OOM (64 MiB ceiling on v7x).
    while _step_bytes(hb, B, tk, tn, itemsize, weight_buffer_depth) > budget:
        nt = _shrink_tile(OUT, tn)
        if nt is not None:
            tn = nt
        else:
            nk = _shrink_tile(IN, tk)
            if nk is None:
                break  # smallest expressible tiles; rely on vmem_limit headroom
            tk = nk
        hb = _pick_heads_per_block(H, B, tk, tn, itemsize, budget, weight_buffer_depth)

    # v7x megacore: expose >= 2 blocks across the two 'parallel' grid axes so the second
    # TensorCore gets work.  Harmless on single-TC v5e/v6e (one extra cheap grid step).
    if (H // hb) * (OUT // tn) < 2:
        if hb > 1:
            cand = hb - 1
            while cand > 1 and H % cand != 0:
                cand -= 1
            hb = cand
        else:
            nt = _shrink_tile(OUT, tn)
            if nt is not None:
                tn = nt

    grid = (H // hb, OUT // tn, IN // tk)

    # Small activation relayout (B*H*IN elements) to head-major; the dominant weight
    # tensor is consumed in its stored layout with zero extra HBM passes.
    # TODO(synk): accept head-major (H, B, IN) activations directly from an upstream
    # producer to drop this pass entirely at very large B.
    x_t = jnp.transpose(x, (1, 0, 2))           # (H, B, IN)
    bias_r = bias.reshape(H, 1, OUT)            # (H, 1, OUT)

    def build(w_depth):
        w_kwargs = {}
        if w_depth is not None and w_depth > 2:
            # Weight is the one stream that must never stall: 3-deep buffering hides
            # DMA issue latency/jitter behind the short per-step compute.
            w_kwargs["pipeline_mode"] = pl.Buffered(w_depth)
        return pl.pallas_call(
            _parallel_linear_kernel,
            out_shape=jax.ShapeDtypeStruct((H, B, OUT), x.dtype),
            grid_spec=pltpu.PrefetchScalarGridSpec(
                num_scalar_prefetch=0,
                grid=grid,
                in_specs=[
                    # x block ignores j; with tk == IN its block index is also constant
                    # in k, so Pallas fetches it once per head group (no re-streaming).
                    pl.BlockSpec((hb, B, tk), lambda hg, j, k: (hg, 0, k)),
                    pl.BlockSpec((hb, tk, tn), lambda hg, j, k: (hg, k, j), **w_kwargs),
                    pl.BlockSpec((hb, 1, tn), lambda hg, j, k: (hg, 0, j)),
                ],
                out_specs=pl.BlockSpec((hb, B, tn), lambda hg, j, k: (hg, 0, j)),
                scratch_shapes=[pltpu.VMEM((hb, B, tn), jnp.float32)],
            ),
            compiler_params=pltpu.CompilerParams(
                dimension_semantics=("parallel", "parallel", "arbitrary"),
                vmem_limit_bytes=vmem_limit,
            ),
        )

    depths = [weight_buffer_depth, 2] if (weight_buffer_depth or 0) > 2 else [2]
    out_t = None
    last_err = None
    for d in depths:
        try:
            out_t = build(d)(x_t, weight_io, bias_r)
            break
        except Exception as e:  # graceful fallback if Buffered(3) is rejected
            last_err = e
    if out_t is None:
        raise last_err

    if return_head_major:
        return out_t                            # (H, B, OUT)
    # TODO(synk): downstream consumers that accept head-major output should pass
    # return_head_major=True -- at large B*OUT this transpose is an extra HBM pass.
    return jnp.transpose(out_t, (1, 0, 2))      # (B, H, OUT)


def init_params(key, heads, in_features, out_features, dtype=jnp.float32):
    """Deterministic init matching the PyTorch module's reset_parameters (torch layout)."""
    k_w, k_b = jax.random.split(key)
    # kaiming_uniform_(a=sqrt(5)) on a (heads, out, in) tensor:
    #   torch fan_in = out_features * in_features, bound = 1/sqrt(fan_in)
    w_bound = 1.0 / math.sqrt(out_features * in_features)
    weight = jax.random.uniform(
        k_w, (heads, out_features, in_features), dtype, -w_bound, w_bound)
    # bias bound uses the module's custom fan_in = weight.size(2) = in_features
    b_bound = 1.0 / math.sqrt(in_features)
    bias = jax.random.uniform(k_b, (heads, out_features), dtype, -b_bound, b_bound)
    return weight, bias


if __name__ == "__main__":
    B, H, IN, OUT = 2, 4, 32, 32
    key = jax.random.PRNGKey(0)
    k_x, k_p = jax.random.split(key)

    x = jax.random.normal(k_x, (B, H, IN), jnp.float32)
    weight, bias = init_params(k_p, H, IN, OUT)      # torch-native (H, OUT, IN)

    # One-off, init-time stored-layout relayout (NOT part of the per-call path).
    weight_io = prepare_weight(weight)               # (H, IN, OUT)

    out = parallel_linear(x, weight_io, bias)
    out = jax.block_until_ready(out)

    # Pure-JAX reference against the torch-native weight layout.
    ref = jnp.einsum("bhi,hoi->bho", x, weight) + bias[None, :, :]
    assert out.shape == (B, H, OUT)
    assert jnp.allclose(out, ref, atol=1e-5, rtol=1e-5), "mismatch vs reference"

    print("KERNEL_OK")
</pallas_src>

<mosaic_0001>
module attributes {stable_mosaic.version = 11 : i64} {
  func.func @_parallel_linear_kernel(%arg0: i32, %arg1: i32, %arg2: i32, %arg3: memref<2x2x32xf32, #tpu.memory_space<vmem>>, %arg4: memref<2x32x32xf32, #tpu.memory_space<vmem>>, %arg5: memref<2x1x32xf32, #tpu.memory_space<vmem>>, %arg6: memref<2x2x32xf32, #tpu.memory_space<vmem>>, %arg7: memref<2x2x32xf32, #tpu.memory_space<vmem>>) attributes {dimension_semantics = [#tpu.dimension_semantics<parallel>, #tpu.dimension_semantics<parallel>, #tpu.dimension_semantics<arbitrary>], iteration_bounds = array<i64: 2, 1, 1>, scalar_prefetch = 0 : i64, scratch_operands = 1 : i64, tpu.core_type = #tpu.core_type<tc>, window_params = [{transform_indices = @transform_0, window_bounds = array<i64: 2, 2, 32>}, {transform_indices = @transform_1, window_bounds = array<i64: 2, 32, 32>}, {transform_indices = @transform_2, window_bounds = array<i64: 2, 1, 32>}, {transform_indices = @transform_3, window_bounds = array<i64: 2, 2, 32>}]} {
    %c0_i32 = arith.constant 0 : i32
    %0 = arith.cmpi eq, %arg2, %c0_i32 : i32
    %1 = arith.extui %0 : i1 to i32
    %c0_i32_0 = arith.constant 0 : i32
    %2 = arith.cmpi ne, %1, %c0_i32_0 : i32
    scf.if %2 {
      %cst_14 = arith.constant 0.000000e+00 : f32
      %12 = vector.broadcast %cst_14 : f32 to vector<2x2x32xf32>
      %c0_15 = arith.constant 0 : index
      %c0_16 = arith.constant 0 : index
      %c0_17 = arith.constant 0 : index
      %13 = vector.load %arg7[%c0_15, %c0_16, %c0_17] : memref<2x2x32xf32, #tpu.memory_space<vmem>>, vector<2x2x32xf32>
      tpu.vector_store %arg7[%c0_15, %c0_16, %c0_17], %12 {strides = array<i32>} : memref<2x2x32xf32, #tpu.memory_space<vmem>>, vector<2x2x32xf32>,
    } else {
    }
    %c0 = arith.constant 0 : index
    %c0_1 = arith.constant 0 : index
    %c0_2 = arith.constant 0 : index
    %3 = vector.load %arg7[%c0, %c0_1, %c0_2] : memref<2x2x32xf32, #tpu.memory_space<vmem>>, vector<2x2x32xf32>
    %c0_3 = arith.constant 0 : index
    %c0_4 = arith.constant 0 : index
    %c0_5 = arith.constant 0 : index
    %4 = vector.load %arg3[%c0_3, %c0_4, %c0_5] : memref<2x2x32xf32, #tpu.memory_space<vmem>>, vector<2x2x32xf32>
    %c0_6 = arith.constant 0 : index
    %c0_7 = arith.constant 0 : index
    %c0_8 = arith.constant 0 : index
    %5 = vector.load %arg4[%c0_6, %c0_7, %c0_8] : memref<2x32x32xf32, #tpu.memory_space<vmem>>, vector<2x32x32xf32>
    "tpu.trace_start"() <{level = 10 : i32, message = "hbk,hkn->hbn"}> : () -> ()
    %cst = arith.constant dense<0.000000e+00> : vector<2x2x32xf32>
    %6 = tpu.matmul %4, %5, %cst {dimension_numbers = #tpu.dot_dimension_numbers<[2], [1], [1], [2], [0, 0, 0, 1, 1, 2], [0], [0]>} : vector<2x2x32xf32>, vector<2x32x32xf32>, vector<2x2x32xf32> -> vector<2x2x32xf32>
    "tpu.trace_stop"() : () -> ()
    %7 = arith.addf %3, %6 : vector<2x2x32xf32>
    %c0_9 = arith.constant 0 : index
    %c0_10 = arith.constant 0 : index
    %c0_11 = arith.constant 0 : index
    %8 = vector.load %arg7[%c0_9, %c0_10, %c0_11] : memref<2x2x32xf32, #tpu.memory_space<vmem>>, vector<2x2x32xf32>
    tpu.vector_store %arg7[%c0_9, %c0_10, %c0_11], %7 {strides = array<i32>} : memref<2x2x32xf32, #tpu.memory_space<vmem>>, vector<2x2x32xf32>,
    %c0_i32_12 = arith.constant 0 : i32
    %9 = arith.cmpi eq, %arg2, %c0_i32_12 : i32
    %10 = arith.extui %9 : i1 to i32
    %c0_i32_13 = arith.constant 0 : i32
    %11 = arith.cmpi ne, %10, %c0_i32_13 : i32
    scf.if %11 {
      %c0_14 = arith.constant 0 : index
      %c0_15 = arith.constant 0 : index
      %c0_16 = arith.constant 0 : index
      %12 = vector.load %arg7[%c0_14, %c0_15, %c0_16] : memref<2x2x32xf32, #tpu.memory_space<vmem>>, vector<2x2x32xf32>
      %c0_17 = arith.constant 0 : index
      %c0_18 = arith.constant 0 : index
      %c0_19 = arith.constant 0 : index
      %13 = vector.load %arg5[%c0_17, %c0_18, %c0_19] : memref<2x1x32xf32, #tpu.memory_space<vmem>>, vector<2x1x32xf32>
      %14 = vector.broadcast %13 : vector<2x1x32xf32> to vector<2x2x32xf32>
      %15 = arith.addf %12, %14 : vector<2x2x32xf32>
      %c0_20 = arith.constant 0 : index
      %c0_21 = arith.constant 0 : index
      %c0_22 = arith.constant 0 : index
      %16 = vector.load %arg6[%c0_20, %c0_21, %c0_22] : memref<2x2x32xf32, #tpu.memory_space<vmem>>, vector<2x2x32xf32>
      tpu.vector_store %arg6[%c0_20, %c0_21, %c0_22], %15 {strides = array<i32>} : memref<2x2x32xf32, #tpu.memory_space<vmem>>, vector<2x2x32xf32>,
    } else {
    }
    return
  }
  func.func @transform_0(%arg0: i32, %arg1: i32, %arg2: i32) -> (i32, i32, i32) {
    %c0_i32 = arith.constant 0 : i32
    %c0_i32_0 = arith.constant 0 : i32
    return %arg0, %c0_i32, %arg2 : i32, i32, i32
  }
  func.func @transform_1(%arg0: i32, %arg1: i32, %arg2: i32) -> (i32, i32, i32) {
    %c0_i32 = arith.constant 0 : i32
    return %arg0, %arg2, %arg1 : i32, i32, i32
  }
  func.func @transform_2(%arg0: i32, %arg1: i32, %arg2: i32) -> (i32, i32, i32) {
    %c0_i32 = arith.constant 0 : i32
    %c0_i32_0 = arith.constant 0 : i32
    return %arg0, %c0_i32, %arg1 : i32, i32, i32
  }
  func.func @transform_3(%arg0: i32, %arg1: i32, %arg2: i32) -> (i32, i32, i32) {
    %c0_i32 = arith.constant 0 : i32
    %c0_i32_0 = arith.constant 0 : i32
    return %arg0, %c0_i32, %arg1 : i32, i32, i32
  }
}

</mosaic_0001>

<bundles_post_ra>
// kernel: tpu_custom_call.1
= control target key start
LH: loop header
LB: loop body
LE: loop exit
PB: predicated region body
PF: predicated region fallthrough
CT: control target
= control target key end

     0   :  { %s1047_s0 = inlined_call_operand.hbm [shape: f32[4,2,32], index: 0, kind: input, shape index: {}]   ;;  %s1048_s1 = inlined_call_operand.hbm [shape: f32[4,32,32], index: 1, kind: input, shape index: {}]   ;;  %s1049_s2 = inlined_call_operand.hbm [shape: f32[4,1,32], index: 2, kind: input, shape index: {}]   ;;  %s1050_s3 = inlined_call_operand.hbm [shape: f32[4,2,32], index: 3, kind: output, shape index: {}]  }
   0x1   :  { %1055 = sst [smem:[#allocation17_spill]] %s1048_s1 }
   0x2   :  { %8 = vsyncpa [#allocation4], 0 }
   0x3   :  { %10 = vsyncpa [#allocation4 + $0x1], 0 }
   0x4   :  { %11 = vsyncpa [#allocation7], 0 }
   0x5   :  { %13 = vsyncpa [#allocation7 + $0x1], 0 }
   0x6   :  { %14 = vsyncpa [#allocation5], 0 }
   0x7   :  { %16 = vsyncpa [#allocation5 + $0x1], 0  ;;  %s871_s12 = smov 0   ;;  %s873_s13 = smov 0  }
   0x8   :  { %s875_s14 = smov 0   ;;  %s877_s15 = smov 0  }
   0x9   :  { %s879_s16 = smov 0   ;;  %s881_s17 = smov 0  }
   0xa LB: > { %1056 = sst [smem:[#allocation13_spill]] %s828_s14  ;;  %s902_s18 = sadd.s32 4294967295, %s840_s17   ;;  %s840_s17 = sphi %s881_s17, %s22_s17   ;;  %s836_s16 = sphi %s879_s16, %s1074_s16   ;;  %s832_s15 = sphi %s877_s15, %s1073_s15   ;;  %s828_s14 = sphi %s875_s14, %s1069_s14   ;;  %s824_s13 = sphi %s873_s13, %s1072_s13   ;;  %s820_s12 = sphi %s871_s12, %s1071_s12  }
   0xb   : > { %1057 = sst [smem:[#allocation14_spill]] %s840_s17  ;;  %s553_s19 = sadd.s32 4294967294, %s840_s17  }
   0xc   : > { %s41_s20 = sadd.s32 1, %s836_s16  ;;  %s50_s21 = sadd.s32 1, %s828_s14 }
   0xd   : > { %p43_p0 = scmp.ge.s32.totalorder %s41_s20, 2  ;;  %p57_p1 = scmp.ne.s32.totalorder %s828_s14, %s824_s13 }
   0xe   : > { %p58_p2 = scmp.eq.s32.totalorder %s840_s17, 0  ;;  %p63_p3 = scmp.ne.s32.totalorder %s824_s13, %s820_s12 }
   0xf   : > { %s1076_s20 = smov (%p43_p0, %s41_s20), 0  ;;  %p64_p5 = scmp.eq.s32.totalorder %s902_s18, 0 }
  0x10   : > { %1058 = sst [smem:[#allocation15_spill]] %s1076_s20  ;;  %p914_p4 = por %p58_p2, %p57_p1 }
  0x11   : > { %s45_s23 = ssub.s32 %s836_s16, %s1076_s20  ;;  %p147_p6 = scmp.eq.s32.totalorder %s902_s18, 1 }
  0x12   : > { %p48_p7 = scmp.eq.s32.totalorder %s45_s23, 0  ;;  %p922_p8 = por %p64_p5, %p63_p3 }
  0x13   : > { %p926_p9 = por %p147_p6, %p57_p1  ;;  %p153_p10 = scmp.eq.s32.totalorder %s553_s19, 1 }
  0x14   : > { %s931_s26 = scalar_select %p48_p7, %s828_s14, %s50_s21  }
  0x15   : > { %p933_p11 = por %p153_p10, %p63_p3  ;;  %p555_p12 = scmp.ge.s32.totalorder %s840_s17, 2 }
  0x16   : > { %1062 = sst [smem:[#allocation16_spill]] %s931_s26  ;;  %p603_p13 = scmp.lt.s32.totalorder %s840_s17, 2 }
  0x17   : > { %s940_s28 = sand.u32 1, %s828_s14   ;;  %s196_s29 = sand.u32 1, %s840_s17  }
  0x18   : > { %s559_s30 = sshll.u32 %s940_s28, 6  ;;  %p946_p0 = pnand %p603_p13, %p914_p4 }
  0x19   : > { %s579_s5 = sshll.u32 %s836_s16, 6  ;;  %s1065_s1 = sld [smem:[#allocation17_spill]] }
  0x1a   : > { %s200_s10 = scalar_lea.vmem [#allocation6], %s559_s30  ;;  %s954_s19 = scalar_lea.sflag [#allocation7], %s196_s29 }
  0x1b   : > { %s212_s11 = sshll.u32 %s200_s10, 4  ;;  %s842_s21 = smov 128   ;;  %s213_s11 = int_to_ptr.vmem [resolvable:$true] %s212_s11 }
  0x1c   : > { %s843_s22 = smov 8   ;;  %p565_p1 = scmp.ge.s32.totalorder %s840_s17, 1 }
  0x1d   : > { %p242_p2 = scmp.lt.s32.totalorder %s840_s17, 3  ;;  %s556_s30 = sshll.u32 %s940_s28, 2 }
  0x1e   : > { %s177_s10 = scalar_lea.vmem [#allocation3], %s556_s30  ;;  %s564_s20 = sshll.u32 %s836_s16, 1 }
  0x1f   : > { %s209_s8 = scalar_lea.hbm %s1065_s1, %s579_s5  ;;  %p961_p3 = pnand %p565_p1, %p242_p2 }
  0x20   : > { %s210_s9 = sshll.u32 %s209_s8, 4  ;;  %s577_s5 = sshll.u32 %s836_s16, 2  ;;  %s211_s9 = int_to_ptr.hbm [resolvable:$true] %s210_s9 }
  0x21   : > { %595 = dma.hbm_to_vmem [thread:$0]  (!%p946_p0), %s211_s9, 1024, %s213_s11, %s954_s19, %s842_s21, %s842_s21, %s843_s22  }
  0x22   : > { %s183_s29 = scalar_lea.hbm %s1047_s0, %s577_s5  ;;  %s186_s1 = sshll.u32 %s177_s10, 4  ;;  %s187_s1 = int_to_ptr.vmem [resolvable:$true] %s186_s1 }
  0x23   : > { %s184_s8 = sshll.u32 %s183_s29, 4  ;;  %s174_s9 = scalar_lea.sflag [#allocation4], %s940_s28  ;;  %s185_s8 = int_to_ptr.hbm [resolvable:$true] %s184_s8 }
  0x24   : > { %s844_s11 = smov 32   ;;  %s845_s21 = smov 2  }
  0x25   : > { %592 = dma.hbm_to_vmem [thread:$0]  (!%p946_p0), %s185_s8, 64, %s187_s1, %s174_s9, %s844_s11, %s844_s11, %s845_s21  }
  0x26   : > { %s563_s22 = sshll.u32 %s940_s28, 1  ;;  %s231_s17 = scalar_lea.hbm %s1049_s2, %s564_s20 }
  0x27   : > { %s232_s6 = sshll.u32 %s231_s17, 4  ;;  %s226_s5 = scalar_lea.vmem [#allocation8], %s563_s22  ;;  %s233_s6 = int_to_ptr.hbm [resolvable:$true] %s232_s6 }
  0x28   : > { %s234_s7 = sshll.u32 %s226_s5, 4  ;;  %s846_s30 = smov 16   ;;  %s235_s7 = int_to_ptr.vmem [resolvable:$true] %s234_s7 }
  0x29   : > { %s847_s29 = smov 1   ;;  %246 = sbr.rel (%p961_p3) target bundleno = 201 (0xc9), region = 32 }
  0x2a   : > { %598 = dma.hbm_to_vmem [thread:$0]  (!%p946_p0), %s233_s6, 32, %s235_s7, %s954_s19, %s846_s30, %s846_s30, %s847_s29  }
  0x2b   : > { %s984_s1 = sand.u32 (!%p961_p3), 1, %s824_s13  }
  0x2c   : > { %s566_s14 = sshll.u32 (!%p961_p3), %s984_s1, 2  ;;  %s249_s17 = scalar_lea.sflag (!%p961_p3), [#allocation4], %s984_s1 }
  0x2d   : > { %s252_s20 = scalar_lea.vmem (!%p961_p3), [#allocation3], %s566_s14 }
  0x2e   : > { %807 = dma.done.wait (%p922_p8), %s249_s17, 64  }
  0x2f   : > { %809 = vsyncadd (%p922_p8), %s249_s17, 4294967232  ;;  %s258_s26 = sand.u32 1, %s902_s18   ;;  %s567_s28 = sshll.u32 %s984_s1, 6 }
  0x30   : > { %s259_s4 = scalar_lea.sflag [#allocation7], %s258_s26  ;;  %s262_s19 = scalar_lea.vmem [#allocation6], %s567_s28 }
  0x31   : > { %811 = dma.done.wait (%p922_p8), %s259_s4, 1056  }
  0x32   : > { %813 = vsyncadd (%p922_p8), %s259_s4, 4294966240  ;;  %vm315_vm0 = vcmask 254976   ;;  %v848_v0 = vmov 0.0   ;;  %v325_v1 = vld [vmem:[%s262_s19 + $0x18] sm:$0xff]  ;;  %v324_v3 = vld [vmem:[%s262_s19 + $0x10] sm:$0xff]  ;;  %vm330_vm1 = vcmask 261120  }
  0x33   : > { %316 = vst.msk [vmem:[#allocation2] sm:$0x3] %vm315_vm0, %v848_v0  ;;  %v329_v2 = vld [vmem:[%s262_s19 + $0x38] sm:$0xff]  ;;  %346 = vmatpush.msra.mxu0 %v325_v1  ;;  %v328_v4 = vld [vmem:[%s262_s19 + $0x30] sm:$0xff]  ;;  %v323_v5 = vld [vmem:[%s262_s19 + $0x8] sm:$0xff]  ;;  %s568_s18 = sshll.u32 %s984_s1, 1 }
  0x34   : > { %317 = vst.msk [vmem:[#allocation2 + $0x2] sm:$0x3] %vm315_vm0, %v848_v0  ;;  %369 = vmatpush.msra.mxu1 %v329_v2  ;;  %v327_v6 = vld [vmem:[%s262_s19 + $0x28] sm:$0xff]  ;;  %v322_v7 = vld [vmem:[%s262_s19] sm:$0xff]  ;;  %v320_v9 = vld [vmem:[%s252_s20] sm:$0x3] }
  0x35   : > { %347 = vmatpush.msra.mxu0 %v324_v3  ;;  %v326_v8 = vld [vmem:[%s262_s19 + $0x20] sm:$0xff]  ;;  %v321_v10 = vld [vmem:[%s252_s20 + $0x2] sm:$0x3]  ;;  %s272_s24 = scalar_lea.vmem [#allocation8], %s568_s18  ;;  %s580_s23 = sshll.u32 %s832_s15, 2 }
  0x36   : > { %370 = vmatpush.msra.mxu1 %v328_v4  ;;  %s412_s9 = scalar_lea.hbm %s1050_s3, %s580_s23  ;;  %v662_v17 = vld [vmem:[%s272_s24] ss:$0 sm:$0xff]  ;;  %v663_v18 = vld [vmem:[%s272_s24 + $0x1] ss:$0 sm:$0xff]  ;;  %s305_s11 = scalar_lea.vmem [#allocation9], %s566_s14 }
  0x37   : > { %348 = vmatpush.msra.mxu0 %v323_v5  ;;  %s413_s21 = sshll.u32 %s305_s11, 4  ;;  %s415_s22 = sshll.u32 %s412_s9, 4  ;;  %s414_s21 = int_to_ptr.vmem [resolvable:$true] %s413_s21  ;;  %s416_s22 = int_to_ptr.hbm [resolvable:$true] %s415_s22 }
  0x38   : > { %371 = vmatpush.msra.mxu1 %v327_v6  ;;  %s400_s15 = scalar_lea.sflag [#allocation5], %s984_s1  ;;  %s768_s6 = sshra.s32 %s416_s22, 4  ;;  %s769_s6 = int_to_ptr.hbm [resolvable:$true] %s768_s6 }
  0x39   : > { %349 = vmatpush.msra.mxu0 %v322_v7  ;;  %s770_s5 = scalar_lea.hbm %s769_s6, 4  ;;  %s774_s29 = scalar_lea.hbm %s1050_s3, 8 }
  0x3a   : > { %372 = vmatpush.msra.mxu1 %v326_v8  ;;  %570 = vmatmul.msk.f32.vlgmr.msra.gmra.mxu0 %vm330_vm1, %v320_v9  ;;  %v318_v11 = vld [vmem:[#allocation2] sm:$0x3]  ;;  %p771_p4 = scmp.ne.s32.totalorder %s769_s6, %s770_s5  ;;  %p775_p7 = scmp.lt.s32.totalorder %s769_s6, %s1050_s3 }
  0x3b   : > { %571 = vmatmul.msk.f32.vlgmr.msra.gmra.mxu1 %vm330_vm1, %v321_v10  ;;  %v319_v12 = vld [vmem:[#allocation2 + $0x2] sm:$0x3]  ;;  %p776_p8 = scmp.lt.s32.totalorder %s774_s29, %s770_s5 }
  0x3c   : > { %p772_p5 = pnand %p771_p4, %p926_p9 }
  0x3d   : > { %p777_p10 = por %p776_p8, %p775_p7 }
  0x3e   : > { %p773_p6 = pneg %p772_p5 }
  0x40   : > { %p778_p13 = pnand %p777_p10, %p773_p6 }
  0xb7   : > { %v351_v13 = vpop.f32.mrf.mxu0 }
  0xb8   : > { %v374_v14 = vpop.f32.mrf.mxu1  ;;  %v377_v15 = vadd.f32 %v351_v13, %v318_v11 }
  0xb9   : > { %v378_v16 = vadd.f32 %v374_v14, %v319_v12 }
  0xba   : > { %380 = vst.msk [vmem:[#allocation2] sm:$0x3] %vm315_vm0, %v377_v15 }
  0xbb   : > { %381 = vst.msk [vmem:[#allocation2 + $0x2] sm:$0x3] %vm315_vm0, %v378_v16 }
  0xc1   : > { %v385_v19 = vld [vmem:[#allocation2] sm:$0x3] }
  0xc2   : > { %v386_v20 = vld [vmem:[#allocation2 + $0x2] sm:$0x3]  ;;  %v395_v21 = vadd.f32 %v662_v17, %v385_v19 }
  0xc3   : > { %v396_v22 = vadd.f32 %v663_v18, %v386_v20 }
  0xc4   : > { %397 = vst.msk [vmem:[%s305_s11] sm:$0x3] %vm315_vm0, %v395_v21 }
  0xc5   : > { %398 = vst.msk [vmem:[%s305_s11 + $0x2] sm:$0x3] %vm315_vm0, %v396_v22 }
  0xc6   : > { %781 = shalt.err (!%p778_p13)
}
  0xc7   : > { %s849_s1 = smov 32   ;;  %s850_s20 = smov 2  }
  0xc8   : > { %587 = dma.vmem_to_hbm [thread:$0]  (%p926_p9), %s414_s21, 64, %s416_s22, %s400_s15, %s849_s1, %s849_s1, %s850_s20  }
  0xc9 PF: > { %s1067_s26 = sld [smem:[#allocation14_spill]]  ;;  %s430_s28 = sand.u32 1, %s820_s12  }
  0xca   : > { %p600_p0 = pnand %p555_p12, %p933_p11  ;;  %s431_s4 = scalar_lea.sflag [#allocation5], %s430_s28 }
  0xcc   : > { %p601_p1 = pneg %p600_p0 }
  0xce   : > { %815 = dma.done.wait (%p601_p1), %s431_s4, 64  }
  0xcf   : > { %817 = vsyncadd (%p601_p1), %s431_s4, 4294967232  ;;  %s22_s17 = sadd.s32 1, %s1067_s26   ;;  %s1068_s19 = sld [smem:[#allocation13_spill]] }
  0xd0   : > { %p19_p2 = scmp.ge.s32.totalorder %s22_s17, 4   ;;  %s1069_s14 = sld [smem:[#allocation16_spill]] }
  0xd1   : > { %s1070_s25 = sld [smem:[#allocation15_spill]]  ;;  %s1071_s12 = smov %s824_s13 }
  0xd2   : > { %s1073_s15 = smov %s836_s16 }
  0xd3   :  { %21 = sbr.rel (!%p19_p2) target bundleno = 10 (0xa), region = 109 }
  0xd5   : > { %s1072_s13 = smov %s1068_s19 }
  0xd7   : > { %s1074_s16 = smov %s1070_s25 }
  0xd8   :  { %437 = vsyncpa [#allocation4], 1 }
  0xd9   :  { %439 = vsyncpa [#allocation4 + $0x1], 1 }
  0xda   :  { %440 = vsyncpa [#allocation7], 1 }
  0xdb   :  { %442 = vsyncpa [#allocation7 + $0x1], 1 }
  0xdc   :  { %443 = vsyncpa [#allocation5], 1 }
  0xdd   :  { %445 = vsyncpa [#allocation5 + $0x1], 1 }

</bundles_post_ra>
